<compile_context>
chip_gen: v7x
topology: tpu7x:2x2x1
jax: 0.10.0
libtpu: 0.0.40
codegen_flags: <defaults>
</compile_context>

<pallas_src>
import jax
import jax.numpy as jnp
import numpy as np
from jax.experimental import pallas as pl
from jax.experimental.pallas import tpu as pltpu


def mlp_diffusion_kernel(
    x_ref,      # (TB, 2)        f32
    t_ref,      # (TB, 1)        i32
    w0_ref,     # (2, H)         f32
    e0_ref,     # (NS, H)        f32   (emb0 + b0, bias pre-folded)
    e1_ref,     # (NS, H)        f32   (emb1 + b1)
    e2_ref,     # (NS, H)        f32   (emb2 + b2)
    w1_ref,     # (H, H)         f32
    w2_ref,     # (H, H)         f32
    w3_ref,     # (H, OUT_PAD)   f32   (cols >= 2 are zero)
    b3_ref,     # (1, OUT_PAD)   f32   (cols >= 2 are zero)
    o_ref,      # (TB, OUT_PAD)  f32
):
    tb = x_ref.shape[0]
    ns = e0_ref.shape[0]

    # ---- In-kernel embedding gather: shared one-hot(t) used for all 3 tables.
    steps = jax.lax.broadcasted_iota(jnp.int32, (tb, ns), 1)
    onehot = jnp.where(steps == t_ref[...], 1.0, 0.0).astype(jnp.float32)  # (TB, NS)

    x = x_ref[...]                                    # (TB, 2)
    w0 = w0_ref[...]                                  # (2, H)

    # ---- Block 0: Linear(2->H) on the VPU (K=2 is degenerate for the MXU),
    #      then (embedding + folded bias) and ReLU.
    h = x[:, 0:1] * w0[0:1, :] + x[:, 1:2] * w0[1:2, :]
    h = h + jnp.dot(onehot, e0_ref[...], preferred_element_type=jnp.float32)
    h = jnp.maximum(h, 0.0)

    # ---- Block 1: Linear(H->H) + embedding(+bias) + ReLU.
    h = jnp.dot(h, w1_ref[...], preferred_element_type=jnp.float32)
    h = h + jnp.dot(onehot, e1_ref[...], preferred_element_type=jnp.float32)
    h = jnp.maximum(h, 0.0)

    # ---- Block 2: Linear(H->H) + embedding(+bias) + ReLU.
    h = jnp.dot(h, w2_ref[...], preferred_element_type=jnp.float32)
    h = h + jnp.dot(onehot, e2_ref[...], preferred_element_type=jnp.float32)
    h = jnp.maximum(h, 0.0)

    # ---- Final: Linear(H->2), written lane-dense into a 128-wide padded slab.
    out = jnp.dot(h, w3_ref[...], preferred_element_type=jnp.float32) + b3_ref[...]
    o_ref[...] = out.astype(o_ref.dtype)


def prepare_params(p, out_pad=128):
    """One-time param prep: fold biases into embedding tables, pad final layer
    to a lane-dense width. Do this once at init, not per forward call."""
    H = p["w1"].shape[0]
    prep = {
        "w0": p["w0"],
        "w1": p["w1"],
        "w2": p["w2"],
        "emb0b": p["emb0"] + p["b0"][None, :],
        "emb1b": p["emb1"] + p["b1"][None, :],
        "emb2b": p["emb2"] + p["b2"][None, :],
        "w3p": jnp.zeros((H, out_pad), jnp.float32).at[:, :2].set(p["w3"]),
        "b3p": jnp.zeros((1, out_pad), jnp.float32).at[0, :2].set(p["b3"]),
    }
    return prep


def mlp_diffusion_forward(x_t, t, prep, *, block_b=512):
    """x_t: (B, 2) float32; t: (B,) int32; prep: output of prepare_params."""
    assert block_b % 8 == 0
    B = x_t.shape[0]
    H = prep["w1"].shape[0]
    NS = prep["emb0b"].shape[0]
    OUT_PAD = prep["w3p"].shape[1]

    # Batch tile: multiple of 8 sublanes, capped at block_b; pad B if needed.
    tb = min(block_b, ((B + 7) // 8) * 8)
    Bp = pl.cdiv(B, tb) * tb
    if Bp != B:
        pad = Bp - B
        x_t = jnp.pad(x_t, ((0, pad), (0, 0)))
        t = jnp.pad(t, ((0, pad),))
    t2d = t.astype(jnp.int32).reshape(Bp, 1)

    row = lambda i: (i, 0)   # batch-tiled operands
    rep = lambda i: (0, 0)   # grid-invariant (VMEM-resident) operands

    out_padded = pl.pallas_call(
        mlp_diffusion_kernel,
        out_shape=jax.ShapeDtypeStruct((Bp, OUT_PAD), jnp.float32),
        grid=(Bp // tb,),
        in_specs=[
            pl.BlockSpec((tb, 2), row),          # x
            pl.BlockSpec((tb, 1), row),          # t
            pl.BlockSpec((2, H), rep),           # w0
            pl.BlockSpec((NS, H), rep),          # emb0 + b0
            pl.BlockSpec((NS, H), rep),          # emb1 + b1
            pl.BlockSpec((NS, H), rep),          # emb2 + b2
            pl.BlockSpec((H, H), rep),           # w1
            pl.BlockSpec((H, H), rep),           # w2
            pl.BlockSpec((H, OUT_PAD), rep),     # w3 (padded)
            pl.BlockSpec((1, OUT_PAD), rep),     # b3 (padded)
        ],
        out_specs=pl.BlockSpec((tb, OUT_PAD), row),
        compiler_params=pltpu.CompilerParams(
            dimension_semantics=("parallel",),   # megacore batch split on v7x
        ),
    )(x_t, t2d, prep["w0"], prep["emb0b"], prep["emb1b"], prep["emb2b"],
      prep["w1"], prep["w2"], prep["w3p"], prep["b3p"])

    # Slice away batch padding and the lane padding of the final layer.
    return out_padded[:B, :2]


def init_params(key, num_uints, num_steps):
    """Deterministic synthetic parameters matching the PyTorch module shapes."""
    ks = jax.random.split(key, 11)
    H = num_uints

    def lin(kw, kb, fan_in, fan_out):
        bound = 1.0 / np.sqrt(fan_in)
        w = jax.random.uniform(kw, (fan_in, fan_out), jnp.float32, -bound, bound)
        b = jax.random.uniform(kb, (fan_out,), jnp.float32, -bound, bound)
        return w, b

    w0, b0 = lin(ks[0], ks[1], 2, H)
    w1, b1 = lin(ks[2], ks[3], H, H)
    w2, b2 = lin(ks[4], ks[5], H, H)
    w3, b3 = lin(ks[6], ks[7], H, 2)
    emb0 = jax.random.normal(ks[8], (num_steps, H), jnp.float32)
    emb1 = jax.random.normal(ks[9], (num_steps, H), jnp.float32)
    emb2 = jax.random.normal(ks[10], (num_steps, H), jnp.float32)
    return dict(w0=w0, b0=b0, w1=w1, b1=b1, w2=w2, b2=b2, w3=w3, b3=b3,
                emb0=emb0, emb1=emb1, emb2=emb2)


def reference_forward(x_t, t, p):
    x = x_t
    for wi, bi, ei in (("w0", "b0", "emb0"), ("w1", "b1", "emb1"), ("w2", "b2", "emb2")):
        x = x @ p[wi] + p[bi]
        x = x + jnp.take(p[ei], t, axis=0)
        x = jnp.maximum(x, 0.0)
    return x @ p["w3"] + p["b3"]


if __name__ == "__main__":
    num_uints = 32   # opt.num_uints
    num_steps = 50   # opt.num_steps
    B = 8

    key = jax.random.PRNGKey(0)
    kx, kt, kp = jax.random.split(key, 3)
    x_t = jax.random.normal(kx, (B, 2), jnp.float32)
    t = jax.random.randint(kt, (B,), 0, num_steps, jnp.int32)
    params = init_params(kp, num_uints, num_steps)

    prep = prepare_params(params)
    out = mlp_diffusion_forward(x_t, t, prep)
    out = jax.block_until_ready(out)

    ref = reference_forward(x_t, t, params)
    np.testing.assert_allclose(np.asarray(out), np.asarray(ref), rtol=1e-5, atol=1e-5)

    print("KERNEL_OK")
</pallas_src>

<mosaic_0001>
module attributes {stable_mosaic.version = 11 : i64} {
  func.func @mlp_diffusion_kernel(%arg0: i32, %arg1: memref<8x2xf32, #tpu.memory_space<vmem>>, %arg2: memref<8x1xi32, #tpu.memory_space<vmem>>, %arg3: memref<2x32xf32, #tpu.memory_space<vmem>>, %arg4: memref<50x32xf32, #tpu.memory_space<vmem>>, %arg5: memref<50x32xf32, #tpu.memory_space<vmem>>, %arg6: memref<50x32xf32, #tpu.memory_space<vmem>>, %arg7: memref<32x32xf32, #tpu.memory_space<vmem>>, %arg8: memref<32x32xf32, #tpu.memory_space<vmem>>, %arg9: memref<32x128xf32, #tpu.memory_space<vmem>>, %arg10: memref<1x128xf32, #tpu.memory_space<vmem>>, %arg11: memref<8x128xf32, #tpu.memory_space<vmem>>) attributes {dimension_semantics = [#tpu.dimension_semantics<parallel>], iteration_bounds = array<i64: 1>, scalar_prefetch = 0 : i64, scratch_operands = 0 : i64, tpu.core_type = #tpu.core_type<tc>, window_params = [{transform_indices = @transform_0, window_bounds = array<i64: 8, 2>}, {transform_indices = @transform_1, window_bounds = array<i64: 8, 1>}, {pipeline_mode = #tpu.pipeline_mode<synchronous>, transform_indices = @transform_2, window_bounds = array<i64: 2, 32>}, {pipeline_mode = #tpu.pipeline_mode<synchronous>, transform_indices = @transform_3, window_bounds = array<i64: 50, 32>}, {pipeline_mode = #tpu.pipeline_mode<synchronous>, transform_indices = @transform_4, window_bounds = array<i64: 50, 32>}, {pipeline_mode = #tpu.pipeline_mode<synchronous>, transform_indices = @transform_5, window_bounds = array<i64: 50, 32>}, {pipeline_mode = #tpu.pipeline_mode<synchronous>, transform_indices = @transform_6, window_bounds = array<i64: 32, 32>}, {pipeline_mode = #tpu.pipeline_mode<synchronous>, transform_indices = @transform_7, window_bounds = array<i64: 32, 32>}, {pipeline_mode = #tpu.pipeline_mode<synchronous>, transform_indices = @transform_8, window_bounds = array<i64: 32, 128>}, {pipeline_mode = #tpu.pipeline_mode<synchronous>, transform_indices = @transform_9, window_bounds = array<i64: 1, 128>}, {transform_indices = @transform_10, window_bounds = array<i64: 8, 128>}]} {
    %0 = tpu.iota {dimensions = array<i32: 1>} : vector<8x50xi32>
    %c0 = arith.constant 0 : index
    %c0_0 = arith.constant 0 : index
    %1 = vector.load %arg2[%c0, %c0_0] : memref<8x1xi32, #tpu.memory_space<vmem>>, vector<8x1xi32>
    %2 = vector.broadcast %1 : vector<8x1xi32> to vector<8x50xi32>
    %3 = arith.cmpi eq, %0, %2 : vector<8x50xi32>
    %cst = arith.constant 1.000000e+00 : f32
    %cst_1 = arith.constant 0.000000e+00 : f32
    %4 = vector.broadcast %cst : f32 to vector<8x50xf32>
    %5 = vector.broadcast %cst_1 : f32 to vector<8x50xf32>
    %6 = arith.select %3, %4, %5 : vector<8x50xi1>, vector<8x50xf32>
    %c0_2 = arith.constant 0 : index
    %c0_3 = arith.constant 0 : index
    %7 = vector.load %arg1[%c0_2, %c0_3] : memref<8x2xf32, #tpu.memory_space<vmem>>, vector<8x2xf32>
    %c0_4 = arith.constant 0 : index
    %c0_5 = arith.constant 0 : index
    %8 = vector.load %arg3[%c0_4, %c0_5] : memref<2x32xf32, #tpu.memory_space<vmem>>, vector<2x32xf32>
    %9 = vector.extract_strided_slice %7 {offsets = [0, 0], sizes = [8, 1], strides = [1, 1]} : vector<8x2xf32> to vector<8x1xf32>
    %10 = vector.extract_strided_slice %8 {offsets = [0, 0], sizes = [1, 32], strides = [1, 1]} : vector<2x32xf32> to vector<1x32xf32>
    %11 = vector.broadcast %9 : vector<8x1xf32> to vector<8x32xf32>
    %12 = vector.broadcast %10 : vector<1x32xf32> to vector<8x32xf32>
    %13 = arith.mulf %11, %12 : vector<8x32xf32>
    %14 = vector.extract_strided_slice %7 {offsets = [0, 1], sizes = [8, 1], strides = [1, 1]} : vector<8x2xf32> to vector<8x1xf32>
    %15 = vector.extract_strided_slice %8 {offsets = [1, 0], sizes = [1, 32], strides = [1, 1]} : vector<2x32xf32> to vector<1x32xf32>
    %16 = vector.broadcast %14 : vector<8x1xf32> to vector<8x32xf32>
    %17 = vector.broadcast %15 : vector<1x32xf32> to vector<8x32xf32>
    %18 = arith.mulf %16, %17 : vector<8x32xf32>
    %19 = arith.addf %13, %18 : vector<8x32xf32>
    %c0_6 = arith.constant 0 : index
    %c0_7 = arith.constant 0 : index
    %20 = vector.load %arg4[%c0_6, %c0_7] : memref<50x32xf32, #tpu.memory_space<vmem>>, vector<50x32xf32>
    %cst_8 = arith.constant dense<0.000000e+00> : vector<8x32xf32>
    %21 = tpu.matmul %6, %20, %cst_8 {dimension_numbers = #tpu.dot_dimension_numbers<[1], [0], [0], [1], [0, 0, 1, 1], [], []>} : vector<8x50xf32>, vector<50x32xf32>, vector<8x32xf32> -> vector<8x32xf32>
    %22 = arith.addf %19, %21 : vector<8x32xf32>
    %cst_9 = arith.constant 0.000000e+00 : f32
    %23 = vector.broadcast %cst_9 : f32 to vector<8x32xf32>
    %24 = arith.maximumf %22, %23 : vector<8x32xf32>
    %c0_10 = arith.constant 0 : index
    %c0_11 = arith.constant 0 : index
    %25 = vector.load %arg7[%c0_10, %c0_11] : memref<32x32xf32, #tpu.memory_space<vmem>>, vector<32x32xf32>
    %cst_12 = arith.constant dense<0.000000e+00> : vector<8x32xf32>
    %26 = tpu.matmul %24, %25, %cst_12 {dimension_numbers = #tpu.dot_dimension_numbers<[1], [0], [0], [1], [0, 0, 1, 1], [], []>} : vector<8x32xf32>, vector<32x32xf32>, vector<8x32xf32> -> vector<8x32xf32>
    %c0_13 = arith.constant 0 : index
    %c0_14 = arith.constant 0 : index
    %27 = vector.load %arg5[%c0_13, %c0_14] : memref<50x32xf32, #tpu.memory_space<vmem>>, vector<50x32xf32>
    %cst_15 = arith.constant dense<0.000000e+00> : vector<8x32xf32>
    %28 = tpu.matmul %6, %27, %cst_15 {dimension_numbers = #tpu.dot_dimension_numbers<[1], [0], [0], [1], [0, 0, 1, 1], [], []>} : vector<8x50xf32>, vector<50x32xf32>, vector<8x32xf32> -> vector<8x32xf32>
    %29 = arith.addf %26, %28 : vector<8x32xf32>
    %cst_16 = arith.constant 0.000000e+00 : f32
    %30 = vector.broadcast %cst_16 : f32 to vector<8x32xf32>
    %31 = arith.maximumf %29, %30 : vector<8x32xf32>
    %c0_17 = arith.constant 0 : index
    %c0_18 = arith.constant 0 : index
    %32 = vector.load %arg8[%c0_17, %c0_18] : memref<32x32xf32, #tpu.memory_space<vmem>>, vector<32x32xf32>
    %cst_19 = arith.constant dense<0.000000e+00> : vector<8x32xf32>
    %33 = tpu.matmul %31, %32, %cst_19 {dimension_numbers = #tpu.dot_dimension_numbers<[1], [0], [0], [1], [0, 0, 1, 1], [], []>} : vector<8x32xf32>, vector<32x32xf32>, vector<8x32xf32> -> vector<8x32xf32>
    %c0_20 = arith.constant 0 : index
    %c0_21 = arith.constant 0 : index
    %34 = vector.load %arg6[%c0_20, %c0_21] : memref<50x32xf32, #tpu.memory_space<vmem>>, vector<50x32xf32>
    %cst_22 = arith.constant dense<0.000000e+00> : vector<8x32xf32>
    %35 = tpu.matmul %6, %34, %cst_22 {dimension_numbers = #tpu.dot_dimension_numbers<[1], [0], [0], [1], [0, 0, 1, 1], [], []>} : vector<8x50xf32>, vector<50x32xf32>, vector<8x32xf32> -> vector<8x32xf32>
    %36 = arith.addf %33, %35 : vector<8x32xf32>
    %cst_23 = arith.constant 0.000000e+00 : f32
    %37 = vector.broadcast %cst_23 : f32 to vector<8x32xf32>
    %38 = arith.maximumf %36, %37 : vector<8x32xf32>
    %c0_24 = arith.constant 0 : index
    %c0_25 = arith.constant 0 : index
    %39 = vector.load %arg9[%c0_24, %c0_25] : memref<32x128xf32, #tpu.memory_space<vmem>>, vector<32x128xf32>
    %cst_26 = arith.constant dense<0.000000e+00> : vector<8x128xf32>
    %40 = tpu.matmul %38, %39, %cst_26 {dimension_numbers = #tpu.dot_dimension_numbers<[1], [0], [0], [1], [0, 0, 1, 1], [], []>} : vector<8x32xf32>, vector<32x128xf32>, vector<8x128xf32> -> vector<8x128xf32>
    %c0_27 = arith.constant 0 : index
    %c0_28 = arith.constant 0 : index
    %41 = vector.load %arg10[%c0_27, %c0_28] : memref<1x128xf32, #tpu.memory_space<vmem>>, vector<1x128xf32>
    %42 = vector.broadcast %41 : vector<1x128xf32> to vector<8x128xf32>
    %43 = arith.addf %40, %42 : vector<8x128xf32>
    %c0_29 = arith.constant 0 : index
    %c0_30 = arith.constant 0 : index
    %44 = vector.load %arg11[%c0_29, %c0_30] : memref<8x128xf32, #tpu.memory_space<vmem>>, vector<8x128xf32>
    tpu.vector_store %arg11[%c0_29, %c0_30], %43 {strides = array<i32>} : memref<8x128xf32, #tpu.memory_space<vmem>>, vector<8x128xf32>,
    return
  }
  func.func @transform_0(%arg0: i32) -> (i32, i32) {
    %c0_i32 = arith.constant 0 : i32
    %c0_i32_0 = arith.constant 0 : i32
    return %arg0, %c0_i32 : i32, i32
  }
  func.func @transform_1(%arg0: i32) -> (i32, i32) {
    %c0_i32 = arith.constant 0 : i32
    %c0_i32_0 = arith.constant 0 : i32
    return %arg0, %c0_i32 : i32, i32
  }
  func.func @transform_2(%arg0: i32) -> (i32, i32) {
    %c0_i32 = arith.constant 0 : i32
    %c0_i32_0 = arith.constant 0 : i32
    %c0_i32_1 = arith.constant 0 : i32
    return %c0_i32, %c0_i32_0 : i32, i32
  }
  func.func @transform_3(%arg0: i32) -> (i32, i32) {
    %c0_i32 = arith.constant 0 : i32
    %c0_i32_0 = arith.constant 0 : i32
    %c0_i32_1 = arith.constant 0 : i32
    return %c0_i32, %c0_i32_0 : i32, i32
  }
  func.func @transform_4(%arg0: i32) -> (i32, i32) {
    %c0_i32 = arith.constant 0 : i32
    %c0_i32_0 = arith.constant 0 : i32
    %c0_i32_1 = arith.constant 0 : i32
    return %c0_i32, %c0_i32_0 : i32, i32
  }
  func.func @transform_5(%arg0: i32) -> (i32, i32) {
    %c0_i32 = arith.constant 0 : i32
    %c0_i32_0 = arith.constant 0 : i32
    %c0_i32_1 = arith.constant 0 : i32
    return %c0_i32, %c0_i32_0 : i32, i32
  }
  func.func @transform_6(%arg0: i32) -> (i32, i32) {
    %c0_i32 = arith.constant 0 : i32
    %c0_i32_0 = arith.constant 0 : i32
    %c0_i32_1 = arith.constant 0 : i32
    return %c0_i32, %c0_i32_0 : i32, i32
  }
  func.func @transform_7(%arg0: i32) -> (i32, i32) {
    %c0_i32 = arith.constant 0 : i32
    %c0_i32_0 = arith.constant 0 : i32
    %c0_i32_1 = arith.constant 0 : i32
    return %c0_i32, %c0_i32_0 : i32, i32
  }
  func.func @transform_8(%arg0: i32) -> (i32, i32) {
    %c0_i32 = arith.constant 0 : i32
    %c0_i32_0 = arith.constant 0 : i32
    %c0_i32_1 = arith.constant 0 : i32
    return %c0_i32, %c0_i32_0 : i32, i32
  }
  func.func @transform_9(%arg0: i32) -> (i32, i32) {
    %c0_i32 = arith.constant 0 : i32
    %c0_i32_0 = arith.constant 0 : i32
    %c0_i32_1 = arith.constant 0 : i32
    return %c0_i32, %c0_i32_0 : i32, i32
  }
  func.func @transform_10(%arg0: i32) -> (i32, i32) {
    %c0_i32 = arith.constant 0 : i32
    %c0_i32_0 = arith.constant 0 : i32
    return %arg0, %c0_i32 : i32, i32
  }
}

</mosaic_0001>

<bundles_post_ra>
// kernel: tpu_custom_call.1
= control target key start
LH: loop header
LB: loop body
LE: loop exit
PB: predicated region body
PF: predicated region fallthrough
CT: control target
= control target key end

     0   :  { %v784_v3 = vmov 0   ;;  %v785_v4 = vmov 1   ;;  %v786_v13 = vmov 0.0|0.0   ;;  %vm787_vm0 = vmmov 0   ;;  %s1008_s0 = inlined_call_operand.vmem [shape: f32[8,2], index: 0, kind: input, shape index: {}]   ;;  %s1009_s1 = inlined_call_operand.vmem [shape: s32[8,1], index: 1, kind: input, shape index: {}]   ;;  %s1010_s2 = inlined_call_operand.vmem [shape: f32[2,32], index: 2, kind: input, shape index: {}]   ;;  %s1011_s3 = inlined_call_operand.vmem [shape: f32[50,32], index: 3, kind: input, shape index: {}]   ;;  %s1012_s4 = inlined_call_operand.vmem [shape: f32[50,32], index: 4, kind: input, shape index: {}]   ;;  %s1013_s5 = inlined_call_operand.vmem [shape: f32[50,32], index: 5, kind: input, shape index: {}]   ;;  %s1014_s6 = inlined_call_operand.vmem [shape: f32[32,32], index: 6, kind: input, shape index: {}]   ;;  %s1015_s7 = inlined_call_operand.vmem [shape: f32[32,32], index: 7, kind: input, shape index: {}]   ;;  %s1016_s8 = inlined_call_operand.vmem [shape: f32[32,128], index: 8, kind: input, shape index: {}]   ;;  %s1017_s9 = inlined_call_operand.vmem [shape: f32[1,128], index: 9, kind: input, shape index: {}]   ;;  %s1018_s10 = inlined_call_operand.hbm [shape: f32[8,128], index: 10, kind: output, shape index: {}]  }
   0x1   :  { %v38_v0 = vld [vmem:[%s1009_s1] sm:$0xff]  ;;  %757 = vset.pattern.permute.xlu0 %v784_v3  ;;  %758 = vset.pattern.permute.xlu1 %v785_v4  ;;  %v67_v5 = vld [vmem:[%s1011_s3 + $0x8] sm:$0xff]  ;;  %v68_v10 = vld [vmem:[%s1011_s3 + $0x10] sm:$0xff]  ;;  %v788_v21 = vmov 0.0  }
   0x2   :  { %v44_v1 = vld [vmem:[%s1008_s0] sm:$0xff]  ;;  %v158_v7 = vld [vmem:[%s1012_s4 + $0x8] sm:$0xff]  ;;  %40 = vperm.xlu0 %757, %v38_v0   ;;  %v69_v11 = vld [vmem:[%s1011_s3 + $0x18] sm:$0xff]  ;;  %702 = vmatprep.subr.bf16.mxu0 %v786_v13 }
   0x3   :  { %v66_v2 = vld [vmem:[%s1011_s3] sm:$0xff]  ;;  %57 = vperm.xlu1 %758, %v44_v1   ;;  %v159_v12 = vld [vmem:[%s1012_s4 + $0x10] sm:$0xff]  ;;  %711 = vmatprep.subr.bf16.mxu1 %v786_v13  ;;  %v160_v14 = vld [vmem:[%s1012_s4 + $0x18] sm:$0xff]  ;;  %v706_v15 = vpack.c.bf16 %v69_v11, %v68_v10 }
   0x4   :  { %v157_v6 = vld [vmem:[%s1012_s4] sm:$0xff]  ;;  %v703_v8 = vpack.c.bf16 %v67_v5, %v66_v2  ;;  %v715_v16 = vpack.c.bf16 %v160_v14, %v159_v12  ;;  %v71_v18 = vld [vmem:[%s1011_s3 + $0x28] sm:$0xff]  ;;  %632 = vmatprep.mubr.msk.f32.mxu0 %vm787_vm0, %v788_v21  ;;  %649 = vmatprep.mubr.msk.f32.mxu1 %vm787_vm0, %v788_v21 }
   0x5   :  { %v712_v9 = vpack.c.bf16 %v158_v7, %v157_v6  ;;  %v70_v17 = vld [vmem:[%s1011_s3 + $0x20] sm:$0xff]  ;;  %v162_v20 = vld [vmem:[%s1012_s4 + $0x28] sm:$0xff] }
   0x6   :  { %704 = vmatpush3.bf16.msra.mxu0 %v703_v8  ;;  %v161_v19 = vld [vmem:[%s1012_s4 + $0x20] sm:$0xff]  ;;  %48 = vperm.xlu0 %757, %v44_v1  }
   0x7   :  { %713 = vmatpush3.bf16.msra.mxu1 %v712_v9  ;;  %705 = vmatprep.subr.bf16.mxu0 %v786_v13 }
   0x8   :  { %714 = vmatprep.subr.bf16.mxu1 %v786_v13 }
   0x9   :  { %15 = vsyncpa [#allocation3], 0  ;;  %v709_v22 = vpack.c.bf16 %v71_v18, %v70_v17  ;;  %v718_v23 = vpack.c.bf16 %v162_v20, %v161_v19  ;;  %v72_v24 = vld [vmem:[%s1011_s3 + $0x30] sm:$0x3]  ;;  %vm77_vm1 = vcmask 1041408   ;;  %v36_v26 = vlaneseq  ;;  %v316_v28 = vld [vmem:[%s1013_s5] sm:$0xff] }
   0xa   :  { %707 = vmatpush3.bf16.msra.mxu0 %v706_v15  ;;  %759 = vset.pattern.permute.xlu0 %v785_v4  ;;  %v163_v25 = vld [vmem:[%s1012_s4 + $0x30] sm:$0x3]  ;;  %v317_v29 = vld [vmem:[%s1013_s5 + $0x8] sm:$0xff]  ;;  %v153_v30 = vld [vmem:[%s1014_s6] sm:$0xff]  ;;  %vm73_vm2 = vcmask 408576   ;;  %vm237_vm4 = vcmask 261120  }
   0xb   :  { %716 = vmatpush3.bf16.msra.mxu1 %v715_v16  ;;  %708 = vmatprep.subr.bf16.mxu0 %v786_v13  ;;  %v37_v27 = vand.u32 127, %v36_v26  ;;  %v154_v31 = vld [vmem:[%s1014_s6 + $0x8] sm:$0xff]  ;;  %v727_v33 = vpack.c.bf16 %v317_v29, %v316_v28  ;;  %v318_v34 = vld [vmem:[%s1013_s5 + $0x10] sm:$0xff]  ;;  %v319_v35 = vld [vmem:[%s1013_s5 + $0x18] sm:$0xff]  ;;  %v52_v52 = vshrl.u32 %v36_v26, 7  ;;  %s789_s13 = smov [#allocation2]  }
   0xc   :  { %717 = vmatprep.subr.bf16.mxu1 %v786_v13  ;;  %v721_v36 = vpack.c.bf16 %v154_v31, %v153_v30  ;;  %v730_v38 = vpack.c.bf16 %v319_v35, %v318_v34  ;;  %v320_v39 = vld [vmem:[%s1013_s5 + $0x20] sm:$0xff]  ;;  %v321_v40 = vld [vmem:[%s1013_s5 + $0x28] sm:$0xff]  ;;  %v322_v42 = vld [vmem:[%s1013_s5 + $0x30] sm:$0x3]  ;;  %s561_s14 = sshll.u32 %s789_s13, 4  ;;  %s562_s14 = int_to_ptr.vmem [resolvable:$true] %s561_s14 }
   0xd   :  { %v733_v41 = vpack.c.bf16 %v321_v40, %v320_v39  ;;  %v155_v43 = vld [vmem:[%s1014_s6 + $0x10] sm:$0xff]  ;;  %v156_v44 = vld [vmem:[%s1014_s6 + $0x18] sm:$0xff]  ;;  %v312_v46 = vld [vmem:[%s1015_s7] sm:$0xff]  ;;  %v62_v53 = vsub.s32 1, %v52_v52  ;;  %v53_v54 = vsub.s32 0, %v52_v52  ;;  %s760_s15 = scalar_lea.vmem %s562_s14, 128  ;;  %p765_p1 = scmp.lt.s32.totalorder %s562_s14, %s562_s14 }
   0xe   :  { %710 = vmatpush3.bf16.msra.mxu0 %v709_v22  ;;  %v724_v45 = vpack.c.bf16 %v156_v44, %v155_v43  ;;  %v313_v47 = vld [vmem:[%s1015_s7 + $0x8] sm:$0xff]  ;;  %v314_v48 = vld [vmem:[%s1015_s7 + $0x10] sm:$0xff]  ;;  %v315_v50 = vld [vmem:[%s1015_s7 + $0x18] sm:$0xff]  ;;  %p761_p0 = scmp.ne.s32.totalorder %s562_s14, %s760_s15  ;;  %p766_p2 = scmp.lt.s32.totalorder %s760_s15, %s760_s15 }
   0xf   :  { %719 = vmatpush3.bf16.msra.mxu1 %v718_v23  ;;  %630 = vmatprep.subr.mxu0 %v788_v21  ;;  %v736_v49 = vpack.c.bf16 %v313_v47, %v312_v46  ;;  %v739_v51 = vpack.c.bf16 %v315_v50, %v314_v48  ;;  %v45_v55 = vld [vmem:[%s1010_s2] sm:$0x3]  ;;  %v471_v4 = vld [vmem:[%s1016_s8 + $0x8] sm:$0xff]  ;;  %v472_v9 = vld [vmem:[%s1016_s8 + $0x10] sm:$0xff] }
  0x10   :  { %647 = vmatprep.subr.mxu1 %v788_v21  ;;  %v63_v56 = vrot.slane %v45_v55, %v62_v53  ;;  %v54_v57 = vrot.slane %v45_v55, %v53_v54  ;;  %v470_v3 = vld [vmem:[%s1016_s8] sm:$0xff]  ;;  %v473_v10 = vld [vmem:[%s1016_s8 + $0x18] sm:$0xff]  ;;  %p767_p3 = por %p766_p2, %p765_p1 }
  0x11   :  { %v742_v5 = vpack.c.bf16 %v471_v4, %v470_v3  ;;  %v745_v11 = vpack.c.bf16 %v473_v10, %v472_v9 }
  0x12   :  { %631 = vmatpush3.msk.msra.mxu0 %vm77_vm1, %v72_v24  ;;  %p768_p4 = pnand %p767_p3, %p761_p0 }
  0x13   :  { %648 = vmatpush3.msk.msra.mxu1 %vm77_vm1, %v163_v25  ;;  %726 = vmatprep.subr.bf16.mxu0 %v786_v13 }
  0x14   :  { %720 = vmatprep.subr.bf16.mxu1 %v786_v13 }
  0x81   :  { %v41_v32 = vpop.permute.xlu0 %40 }
  0x82   :  { %vm42_vm3 = vcmp.eq.s32.totalorder %v37_v27, %v41_v32  ;;  %v58_v58 = vpop.permute.xlu1 %57 }
  0x83   :  { %v43_v37 = vsel %vm42_vm3, 1.0, %v788_v21  ;;  %v64_v60 = vmul.f32 %v63_v56, %v58_v58 }
  0x84   :  { %633 = vmatmul.mubr.msk.f32.vlgmr.msra.gmra.mrb[0].mxu0 %vm73_vm2, %v43_v37  ;;  %650 = vmatmul.mubr.msk.f32.vlgmr.msra.gmra.mrb[0].mxu1 %vm73_vm2, %v43_v37 }
  0x85   :  { %728 = vmatpush3.bf16.msra.mxu0 %v727_v33  ;;  %677 = vmatprep.mubr.msk.f32.mxu0 %vm787_vm0, %v788_v21  ;;  %v49_v59 = vpop.permute.xlu0 %48 }
  0x86   :  { %729 = vmatprep.subr.bf16.mxu0 %v786_v13  ;;  %722 = vmatpush3.bf16.msra.mxu1 %v721_v36  ;;  %v55_v61 = vmul.f32 %v54_v57, %v49_v59 }
  0x87   :  { %723 = vmatprep.subr.bf16.mxu1 %v786_v13  ;;  %660 = vmatprep.mubr.msk.f32.mxu1 %vm787_vm0, %v788_v21 }
  0x88   :  { %v65_v62 = vadd.f32 %v64_v60, %v55_v61 }
  0x89   :  { %731 = vmatpush3.bf16.msra.mxu0 %v730_v38 }
  0x8a   :  { %732 = vmatprep.subr.bf16.mxu0 %v786_v13  ;;  %725 = vmatpush3.bf16.msra.mxu1 %v724_v45 }
  0x8b   :  { %741 = vmatprep.subr.bf16.mxu1 %v786_v13 }
  0x8d   :  { %734 = vmatpush3.bf16.msra.mxu0 %v733_v41 }
  0x8e   :  { %675 = vmatprep.subr.mxu0 %v788_v21 }
  0x91   :  { %676 = vmatpush3.msk.msra.mxu0 %vm77_vm1, %v322_v42 }
  0x92   :  { %678 = vmatmul.mubr.msk.f32.vlgmr.msra.gmra.mrb[2].mxu0 %vm73_vm2, %v43_v37  ;;  %735 = vmatprep.subr.bf16.mxu0 %v786_v13 }
  0x93   :  { %688 = vmatprep.mubr.msk.f32.mxu0 %vm787_vm0, %v788_v21  ;;  %737 = vmatpush3.bf16.msra.mxu0 %v736_v49 }
  0x94   :  { %738 = vmatprep.subr.bf16.mxu0 %v786_v13 }
  0x97   :  { %740 = vmatpush3.bf16.msra.mxu0 %v739_v51 }
 0x157   :  { %v147_v63 = vpop.f32.mrb[0].mxu0 }
 0x158   :  { %v151_v0 = vadd.f32 %v147_v63, %v65_v62  ;;  %v634_v1 = vpop.f32.mrb[1].mxu0 }
 0x15a   :  { %v152_v2 = vmax.f32 %v151_v0, 0.0 }
 0x15c   :  { %661 = vmatmul.mubr.msk.f32.vlgmr.msra.gmra.mrb[0].mxu1 %vm237_vm4, %v152_v2 }
 0x15d   :  { %699 = vmatprep.mubr.msk.f32.mxu1 %vm787_vm0, %v788_v21  ;;  %743 = vmatpush3.bf16.msra.mxu1 %v742_v5 }
 0x15e   :  { %744 = vmatprep.subr.bf16.mxu1 %v786_v13  ;;  %v577_v13 = vld [vmem:[%s1017_s9] ss:$0 sm:$0xff] }
 0x161   :  { %746 = vmatpush3.bf16.msra.mxu1 %v745_v11 }
 0x22f   :  { %v307_v6 = vpop.f32.mrb[0].mxu1 }
 0x230   :  { %v311_v7 = vmax.f32 %v307_v6, 0.0  ;;  %v662_v8 = vpop.f32.mrb[1].mxu1 }
 0x232   :  { %689 = vmatmul.mubr.msk.f32.vlgmr.msra.gmra.mrb[2].mxu0 %vm237_vm4, %v311_v7 }
 0x305   :  { %v465_v12 = vpop.f32.mrb[2].mxu0 }
 0x306   :  { %v469_v14 = vmax.f32 %v465_v12, 0.0  ;;  %v690_v15 = vpop.f32.mrb[3].mxu0 }
 0x308   :  { %700 = vmatmul.mubr.msk.f32.vlgmr.msra.gmra.mrb[2].mxu1 %vm237_vm4, %v469_v14 }
 0x3db   :  { %v550_v16 = vpop.f32.mrb[2].mxu1 }
 0x3dc   :  { %v551_v17 = vadd.f32 %v577_v13, %v550_v16  ;;  %v701_v18 = vpop.f32.mrb[3].mxu1 }
 0x3de   :  { %554 = vst [vmem:[#allocation2] sm:$0xff] %v551_v17 }
 0x3df   :  { %771 = shalt.err (!%p768_p4)
}
 0x3e0   :  { %s772_s17 = scalar_lea.hbm %s1018_s10, 128 }
 0x3e1   :  { %p773_p5 = scmp.ne.s32.totalorder %s1018_s10, %s772_s17  ;;  %p776_p6 = scmp.lt.u32.totalorder %s772_s17, %s1018_s10 }
 0x3e3   :  { %p778_p7 = pnand %p776_p6, %p773_p5 }
 0x3e5   :  { %781 = shalt.err (!%p778_p7)
}
 0x3e6   :  { %564 = dma.vmem_to_hbm [thread:$0]  %s562_s14, 128, %s1018_s10, [#allocation3]  }
 0x3e7   :  { %782 = dma.done.wait [#allocation3], 128  }
 0x3e8   :  { %783 = vsyncadd [#allocation3], 4294967168 }
 0x3e9   :  { %568 = vsyncpa [#allocation3], 1 }

</bundles_post_ra>
